<compile_context>
chip_gen: v7x
topology: tpu7x:2x2x1
jax: 0.10.0
libtpu: 0.0.40
codegen_flags: <defaults>
</compile_context>

<pallas_src>
import functools
import math

import jax
import jax.numpy as jnp
from jax import lax
from jax.experimental import pallas as pl
from jax.experimental.pallas import tpu as pltpu


# ----------------------------------------------------------------------------
# helpers
# ----------------------------------------------------------------------------
def _round_up(x, m):
    return ((x + m - 1) // m) * m


def _log_sigmoid(z):
    # numerically stable log(sigmoid(z)) = min(z,0) - log(1 + exp(-|z|))
    return jnp.minimum(z, 0.0) - jnp.log(1.0 + jnp.exp(-jnp.abs(z)))


def _l2_normalize(a):
    # F.normalize(..., dim=-1), eps = 1e-12 (clamp on the norm)
    n = jnp.sqrt(jnp.sum(a * a, axis=-1, keepdims=True))
    return a / jnp.maximum(n, 1e-12)


def _tpu_params():
    """Per-generation knobs: scoped-VMEM limit, MXU lane alignment, #cores."""
    kind = ""
    try:
        kind = jax.devices()[0].device_kind.lower()
    except Exception:
        pass
    vmem_phys = 64 * 1024 * 1024 if "v7" in kind else 128 * 1024 * 1024
    try:  # prefer the official query when available
        vmem_phys = int(pltpu.get_tpu_info().vmem_capacity_bytes)
    except Exception:
        pass
    # ~15% headroom; never above the 96 MiB that v5e/v6e tolerate comfortably.
    vmem_limit = min(int(vmem_phys * 0.85), 96 * 1024 * 1024)
    mxu_align = 256 if ("v6" in kind or "v7" in kind) else 128
    two_cores = "v7" in kind            # v7x: 2 TensorCores share the chip
    return vmem_limit, mxu_align, two_cores


def downsample_text_features_jax(text_features, batch_size, num_captions, key):
    """JAX equivalent of downsample_text_features (random offsets from `key`)."""
    B, K = batch_size, num_captions
    own = jnp.arange(B * K, dtype=jnp.int32).reshape(B, K)      # caption_indices
    idx = jnp.arange(B, dtype=jnp.int32)
    other = jnp.stack(
        [jnp.concatenate([idx[:i], idx[i + 1:]]) for i in range(B)], axis=0
    )                                                           # (B, B-1)
    offsets = jax.random.randint(key, (B, B - 1), 0, K, dtype=jnp.int32)
    other_cap = own[other, offsets]                             # (B, B-1)
    combined = jnp.concatenate([own, other_cap], axis=1)        # (B, K+B-1)
    combined = jnp.sort(combined, axis=1)
    flat = combined.reshape(-1)
    ds = jnp.take(text_features, flat, axis=0)
    return ds.reshape(B, K + B - 1, text_features.shape[-1])


# ----------------------------------------------------------------------------
# Pallas kernel 1: text-conditioned sigmoid loss (attention pool + tcs logits)
#   - one grid step handles TB images, emits one per-block partial loss sum.
# ----------------------------------------------------------------------------
def _tcs_kernel(t_ref, x_ref, wq_ref, wkv_ref, wo_ref, scale_ref, bias_ref,
                out_ref, *, num_captions, valid_m, valid_l):
    bb = pl.program_id(0)
    tb, mp, d = t_ref.shape                    # (TB, Mp, D) bf16, Mp mult of 16
    lp = x_ref.shape[1]                        # Lp mult of 16 (MXU-aligned if big)

    t_bf = t_ref[...]                          # (tb, mp, d) bf16
    x_bf = x_ref[...]                          # (tb, lp, d) bf16

    # --- projections: fold batch into rows so the MXU sees tall matrices.
    #     Cast each result to bf16 once; only the bf16 copy stays live.
    q = jnp.dot(t_bf.reshape(tb * mp, d), wq_ref[...],
                preferred_element_type=jnp.float32
                ).astype(jnp.bfloat16).reshape(tb, mp, d)
    kv = jnp.dot(x_bf.reshape(tb * lp, d), wkv_ref[...],
                 preferred_element_type=jnp.float32).astype(jnp.bfloat16)
    k = kv[:, :d].reshape(tb, lp, d)
    v = kv[:, d:].reshape(tb, lp, d)

    # --- per-image cross attention (bf16 MXU operands, f32 softmax) ---------
    s = jnp.einsum("bme,ble->bml", q, k,
                   preferred_element_type=jnp.float32) * (1.0 / math.sqrt(d))
    if lp > valid_l:                           # small additive mask, once per step
        lmask = lax.broadcasted_iota(jnp.int32, (1, 1, lp), 2) < valid_l
        s = s + jnp.where(lmask, 0.0, -1e30)
    s = s - jnp.max(s, axis=-1, keepdims=True)
    p = jnp.exp(s)
    p = (p * pl.reciprocal(jnp.sum(p, axis=-1, keepdims=True), approx=True)
         ).astype(jnp.bfloat16)
    ctx = jnp.einsum("bml,ble->bme", p, v,
                     preferred_element_type=jnp.float32).astype(jnp.bfloat16)
    local = jnp.dot(ctx.reshape(tb * mp, d), wo_ref[...],
                    preferred_element_type=jnp.float32).reshape(tb, mp, d)

    # --- fused normalize + lane-dense tcs logits (tb, mp) -------------------
    # logits = scale * <o,t> / (max(|o|,1e-12)*max(|t|,1e-12)) + bias,
    # done as rsqrt of the product of squared norms (clamp 1e-24 == 1e-12^2).
    t_f = t_bf.astype(jnp.float32)
    raw = jnp.sum(local * t_f, axis=-1)                                  # (tb, mp)
    n2 = jnp.sum(local * local, axis=-1) * jnp.sum(t_f * t_f, axis=-1)   # (tb, mp)
    logits = scale_ref[0] * raw * lax.rsqrt(jnp.maximum(n2, 1e-24)) + bias_ref[0]

    # ground truth: image g has +1 on cols [g, g+K)
    row = lax.broadcasted_iota(jnp.int32, (tb, mp), 0)
    col = lax.broadcasted_iota(jnp.int32, (tb, mp), 1)
    g = bb * tb + row
    labels = jnp.where((col >= g) & (col < g + num_captions), 1.0, -1.0)
    elem = -_log_sigmoid(labels * logits)
    if mp > valid_m:                           # padded caption columns -> 0
        elem = jnp.where(col < valid_m, elem, 0.0)

    # independent per-block output -> grid axis can be "parallel"
    out_ref[...] = jnp.full(out_ref.shape, jnp.sum(elem), jnp.float32)


# ----------------------------------------------------------------------------
# Pallas kernel 2: multi-positive sigmoid loss, tiled over the caption axis.
#   logits are computed transposed, (tcol, B): the wide caption tile is the
#   MXU M dimension (B is typically < 128).
# ----------------------------------------------------------------------------
def _mps_kernel(gimg_ref, gtxt_ref, scale_ref, bias_ref, out_ref, *,
                num_captions, valid_bk, has_pad):
    i = pl.program_id(0)
    tcol, d = gtxt_ref.shape                   # caption tile
    b = gimg_ref.shape[0]

    gi = gimg_ref[...]                         # (B, D) bf16, pre-normalized
    gt_f = gtxt_ref[...].astype(jnp.float32)
    inv_n = lax.rsqrt(jnp.maximum(jnp.sum(gt_f * gt_f, axis=-1, keepdims=True),
                                  1e-24))
    gt = (gt_f * inv_n).astype(jnp.bfloat16)   # (tcol, D)

    logits = scale_ref[0] * lax.dot_general(
        gt, gi, (((1,), (1,)), ((), ())),
        preferred_element_type=jnp.float32) + bias_ref[0]          # (tcol, B)

    cap = lax.broadcasted_iota(jnp.int32, (tcol, b), 0) + i * tcol  # caption idx
    img = lax.broadcasted_iota(jnp.int32, (tcol, b), 1)             # image idx
    labels = jnp.where((cap >= img * num_captions) &
                       (cap < (img + 1) * num_captions), 1.0, -1.0)
    elem = -_log_sigmoid(labels * logits)
    if has_pad:
        elem = jnp.where(cap < valid_bk, elem, 0.0)
    out_ref[...] = jnp.full(out_ref.shape, jnp.sum(elem), jnp.float32)


# ----------------------------------------------------------------------------
# wrapper (FlairLoss.forward, world_size=1)
# ----------------------------------------------------------------------------
def flair_loss_forward(image_features, text_features, logit_scale, logit_bias,
                       image_tokens, proj_weights, *, num_cap_per_img,
                       added_mps_loss, key, batch_tile=None, mps_col_tile=None):
    wq, wk, wv, wo = proj_weights
    B, L, D = image_tokens.shape
    K = num_cap_per_img
    M = K + B - 1
    assert D % 128 == 0, "embedding dim must be a multiple of 128 (lane width)"

    vmem_limit, mxu_align, two_cores = _tpu_params()

    # ---- tile choices -------------------------------------------------------
    if batch_tile is None:
        cap = 4 if two_cores else 8            # bound the live f32 set on v7x
        cands = [c for c in range(min(B, cap), 0, -1) if B % c == 0]
        batch_tile = cands[0] if cands else 1
        if two_cores:                          # prefer an even n_blk for 2 TCs
            even = [c for c in cands if (B // c) % 2 == 0]
            if even:
                batch_tile = even[0]
    assert B % batch_tile == 0
    n_blk = B // batch_tile

    # bf16 native sublane tile is (16,128): pad to 16 so the batch-fold
    # reshapes never cross a tile boundary (no hidden relayout copies).
    Mp = _round_up(M, 16)
    Lp = _round_up(L, 16)
    if Lp >= 128:                              # fill the score-matmul lane dim
        Lp = _round_up(Lp, mxu_align)

    # ---- prepare inputs: pad + bf16 MXU operands, fused wkv ----------------
    ds = downsample_text_features_jax(text_features, B, K, key)      # (B, M, D)
    ds_p = jnp.pad(ds, ((0, 0), (0, Mp - M), (0, 0))).astype(jnp.bfloat16)
    img_p = jnp.pad(image_tokens, ((0, 0), (0, Lp - L), (0, 0))).astype(jnp.bfloat16)
    wq_b = wq.astype(jnp.bfloat16)
    wkv_b = jnp.concatenate([wk, wv], axis=1).astype(jnp.bfloat16)    # (D, 2D)
    wo_b = wo.astype(jnp.bfloat16)

    scale = jnp.reshape(jnp.asarray(logit_scale, jnp.float32), (1,))
    bias = jnp.reshape(jnp.asarray(logit_bias, jnp.float32), (1,))

    # grid-invariant operands: single resident VMEM copy (no double buffering)
    resident_vmem = pl.BlockSpec(memory_space=pltpu.MemorySpace.VMEM)
    smem = pl.BlockSpec(memory_space=pltpu.MemorySpace.SMEM)

    tcs_partials = pl.pallas_call(
        functools.partial(_tcs_kernel, num_captions=K, valid_m=M, valid_l=L),
        out_shape=jax.ShapeDtypeStruct((n_blk, 8, 128), jnp.float32),
        grid_spec=pltpu.PrefetchScalarGridSpec(
            num_scalar_prefetch=0,
            grid=(n_blk,),
            in_specs=[
                pl.BlockSpec((batch_tile, Mp, D), lambda b: (b, 0, 0)),
                pl.BlockSpec((batch_tile, Lp, D), lambda b: (b, 0, 0)),
                resident_vmem,        # wq
                resident_vmem,        # wkv
                resident_vmem,        # wo
                smem,                 # logit_scale
                smem,                 # logit_bias
            ],
            out_specs=pl.BlockSpec((1, 8, 128), lambda b: (b, 0, 0)),
        ),
        compiler_params=pltpu.CompilerParams(
            dimension_semantics=("parallel",),
            vmem_limit_bytes=vmem_limit),
    )(ds_p, img_p, wq_b, wkv_b, wo_b, scale, bias)
    tcs = jnp.sum(tcs_partials[:, 0, 0]) / M     # divide by text_features.shape[1]

    if not added_mps_loss:
        return tcs

    BK = text_features.shape[0]
    if mps_col_tile is None:
        mps_col_tile = 512 if BK > 512 else BK
    tcol = _round_up(mps_col_tile, mxu_align if BK > 128 else 16)
    BKp = _round_up(BK, tcol)
    n_tile = BKp // tcol

    gtxt_p = jnp.pad(text_features, ((0, BKp - BK), (0, 0))).astype(jnp.bfloat16)
    # hoist the grid-invariant image-feature L2-normalize out of the kernel
    gimg_b = _l2_normalize(
        image_features.astype(jnp.bfloat16).astype(jnp.float32)
    ).astype(jnp.bfloat16)

    mps_partials = pl.pallas_call(
        functools.partial(_mps_kernel, num_captions=K, valid_bk=BK,
                          has_pad=BKp > BK),
        out_shape=jax.ShapeDtypeStruct((n_tile, 8, 128), jnp.float32),
        grid_spec=pltpu.PrefetchScalarGridSpec(
            num_scalar_prefetch=0,
            grid=(n_tile,),
            in_specs=[
                resident_vmem,                              # normalized (B, D)
                pl.BlockSpec((tcol, D), lambda i: (i, 0)),  # caption tile
                smem,
                smem,
            ],
            out_specs=pl.BlockSpec((1, 8, 128), lambda i: (i, 0, 0)),
        ),
        compiler_params=pltpu.CompilerParams(
            dimension_semantics=("parallel",),
            vmem_limit_bytes=vmem_limit),
    )(gimg_b, gtxt_p, scale, bias)
    mps = jnp.sum(mps_partials[:, 0, 0]) / BK

    return (tcs + mps) / 2.0


# ----------------------------------------------------------------------------
# pure-JAX reference (mirrors the PyTorch math, with the same bf16-operand /
# f32-accumulation matmul precision as the kernel) for a sanity check
# ----------------------------------------------------------------------------
def flair_loss_reference(image_features, text_features, logit_scale, logit_bias,
                         image_tokens, proj_weights, *, num_cap_per_img,
                         added_mps_loss, key):
    wq, wk, wv, wo = proj_weights
    B, L, D = image_tokens.shape
    K = num_cap_per_img
    M = K + B - 1
    f32 = jnp.float32
    bf = lambda a: a.astype(jnp.bfloat16)

    ds = downsample_text_features_jax(text_features, B, K, key)
    ds_b, x_b = bf(ds), bf(image_tokens)

    q = jnp.einsum("bmd,de->bme", ds_b, bf(wq), preferred_element_type=f32)
    k = jnp.einsum("bld,de->ble", x_b, bf(wk), preferred_element_type=f32)
    v = jnp.einsum("bld,de->ble", x_b, bf(wv), preferred_element_type=f32)
    s = jnp.einsum("bme,ble->bml", bf(q), bf(k),
                   preferred_element_type=f32) / math.sqrt(D)
    p = jax.nn.softmax(s, axis=-1)
    ctx = jnp.einsum("bml,ble->bme", bf(p), bf(v), preferred_element_type=f32)
    local = jnp.einsum("bme,ef->bmf", bf(ctx), bf(wo), preferred_element_type=f32)

    o_n = _l2_normalize(local)
    t_n = _l2_normalize(ds_b.astype(f32))
    logits = logit_scale * jnp.sum(o_n * t_n, axis=-1) + logit_bias   # (B, M)

    j = jnp.arange(M)[None, :]
    i = jnp.arange(B)[:, None]
    labels = jnp.where((j >= i) & (j < i + K), 1.0, -1.0)
    tcs = -jnp.sum(_log_sigmoid(labels * logits)) / M

    if not added_mps_loss:
        return tcs

    gi = _l2_normalize(bf(image_features).astype(f32))
    gt = _l2_normalize(bf(text_features).astype(f32))
    mlogits = logit_scale * jnp.einsum("bd,cd->bc", bf(gi), bf(gt),
                                       preferred_element_type=f32) + logit_bias
    BK = text_features.shape[0]
    r = jnp.arange(B)[:, None]
    c = jnp.arange(BK)[None, :]
    mlabels = jnp.where((c >= r * K) & (c < (r + 1) * K), 1.0, -1.0)
    mps = -jnp.sum(_log_sigmoid(mlabels * mlogits)) / BK
    return (tcs + mps) / 2.0


# ----------------------------------------------------------------------------
if __name__ == "__main__":
    B, L, D, K = 4, 16, 128, 4      # batch, image tokens, embed dim, caps/img

    root = jax.random.PRNGKey(0)
    k_img, k_tok, k_txt, kq, kk, kv, ko, k_ds = jax.random.split(root, 8)

    image_features = jax.random.normal(k_img, (B, D), jnp.float32)
    image_tokens = jax.random.normal(k_tok, (B, L, D), jnp.float32)
    text_features = jax.random.normal(k_txt, (B * K, D), jnp.float32)

    # deterministic "visual_proj" (single-head cross-attention) weights
    wq = jax.random.normal(kq, (D, D), jnp.float32) / math.sqrt(D)
    wk = jax.random.normal(kk, (D, D), jnp.float32) / math.sqrt(D)
    wv = jax.random.normal(kv, (D, D), jnp.float32) / math.sqrt(D)
    wo = jax.random.normal(ko, (D, D), jnp.float32) / math.sqrt(D)
    proj = (wq, wk, wv, wo)

    logit_scale = jnp.float32(10.0)
    logit_bias = jnp.float32(-10.0)

    for mps_flag in (False, True):
        out = flair_loss_forward(
            image_features, text_features, logit_scale, logit_bias,
            image_tokens, proj, num_cap_per_img=K,
            added_mps_loss=mps_flag, key=k_ds, batch_tile=2)
        out = jax.block_until_ready(out)
        ref = flair_loss_reference(
            image_features, text_features, logit_scale, logit_bias,
            image_tokens, proj, num_cap_per_img=K,
            added_mps_loss=mps_flag, key=k_ds)
        assert jnp.allclose(out, ref, rtol=1e-2, atol=1e-2), (mps_flag, out, ref)

    print("KERNEL_OK")
</pallas_src>

<mosaic_0001>
module attributes {stable_mosaic.version = 11 : i64} {
  func.func @_tcs_kernel(%arg0: i32, %arg1: memref<2x16x128xbf16, #tpu.memory_space<vmem>>, %arg2: memref<2x16x128xbf16, #tpu.memory_space<vmem>>, %arg3: memref<128x128xbf16, #tpu.memory_space<vmem>>, %arg4: memref<128x256xbf16, #tpu.memory_space<vmem>>, %arg5: memref<128x128xbf16, #tpu.memory_space<vmem>>, %arg6: memref<1xf32, #tpu.memory_space<smem>>, %arg7: memref<1xf32, #tpu.memory_space<smem>>, %arg8: memref<1x8x128xf32, #tpu.memory_space<vmem>>) attributes {dimension_semantics = [#tpu.dimension_semantics<parallel>], iteration_bounds = array<i64: 2>, scalar_prefetch = 0 : i64, scratch_operands = 0 : i64, tpu.core_type = #tpu.core_type<tc>, window_params = [{transform_indices = @transform_0, window_bounds = array<i64: 2, 16, 128>}, {transform_indices = @transform_1, window_bounds = array<i64: 2, 16, 128>}, {pipeline_mode = #tpu.pipeline_mode<synchronous>, transform_indices = @transform_2, window_bounds = array<i64: 128, 128>}, {pipeline_mode = #tpu.pipeline_mode<synchronous>, transform_indices = @transform_3, window_bounds = array<i64: 128, 256>}, {pipeline_mode = #tpu.pipeline_mode<synchronous>, transform_indices = @transform_4, window_bounds = array<i64: 128, 128>}, {transform_indices = @transform_5, window_bounds = array<i64: 1>}, {transform_indices = @transform_6, window_bounds = array<i64: 1>}, {transform_indices = @transform_7, window_bounds = array<i64: 1, 8, 128>}]} {
    %c0 = arith.constant 0 : index
    %c0_0 = arith.constant 0 : index
    %c0_1 = arith.constant 0 : index
    %0 = vector.load %arg1[%c0, %c0_0, %c0_1] : memref<2x16x128xbf16, #tpu.memory_space<vmem>>, vector<2x16x128xbf16>
    %c0_2 = arith.constant 0 : index
    %c0_3 = arith.constant 0 : index
    %c0_4 = arith.constant 0 : index
    %1 = vector.load %arg2[%c0_2, %c0_3, %c0_4] : memref<2x16x128xbf16, #tpu.memory_space<vmem>>, vector<2x16x128xbf16>
    %2 = vector.shape_cast %0 : vector<2x16x128xbf16> to vector<32x128xbf16>
    %c0_5 = arith.constant 0 : index
    %c0_6 = arith.constant 0 : index
    %3 = vector.load %arg3[%c0_5, %c0_6] : memref<128x128xbf16, #tpu.memory_space<vmem>>, vector<128x128xbf16>
    %cst = arith.constant dense<0.000000e+00> : vector<32x128xf32>
    %4 = tpu.matmul %2, %3, %cst {dimension_numbers = #tpu.dot_dimension_numbers<[1], [0], [0], [1], [0, 0, 1, 1], [], []>} : vector<32x128xbf16>, vector<128x128xbf16>, vector<32x128xf32> -> vector<32x128xf32>
    %5 = arith.truncf %4 : vector<32x128xf32> to vector<32x128xbf16>
    %6 = vector.shape_cast %5 : vector<32x128xbf16> to vector<2x16x128xbf16>
    %7 = vector.shape_cast %1 : vector<2x16x128xbf16> to vector<32x128xbf16>
    %c0_7 = arith.constant 0 : index
    %c0_8 = arith.constant 0 : index
    %8 = vector.load %arg4[%c0_7, %c0_8] : memref<128x256xbf16, #tpu.memory_space<vmem>>, vector<128x256xbf16>
    %cst_9 = arith.constant dense<0.000000e+00> : vector<32x256xf32>
    %9 = tpu.matmul %7, %8, %cst_9 {dimension_numbers = #tpu.dot_dimension_numbers<[1], [0], [0], [1], [0, 0, 1, 1], [], []>} : vector<32x128xbf16>, vector<128x256xbf16>, vector<32x256xf32> -> vector<32x256xf32>
    %10 = arith.truncf %9 : vector<32x256xf32> to vector<32x256xbf16>
    %11 = vector.extract_strided_slice %10 {offsets = [0, 0], sizes = [32, 128], strides = [1, 1]} : vector<32x256xbf16> to vector<32x128xbf16>
    %12 = vector.shape_cast %11 : vector<32x128xbf16> to vector<2x16x128xbf16>
    %13 = vector.extract_strided_slice %10 {offsets = [0, 128], sizes = [32, 128], strides = [1, 1]} : vector<32x256xbf16> to vector<32x128xbf16>
    %14 = vector.shape_cast %13 : vector<32x128xbf16> to vector<2x16x128xbf16>
    "tpu.trace_start"() <{level = 10 : i32, message = "bme,ble->bml"}> : () -> ()
    %cst_10 = arith.constant dense<0.000000e+00> : vector<2x16x16xf32>
    %15 = tpu.matmul %6, %12, %cst_10 {dimension_numbers = #tpu.dot_dimension_numbers<[2], [2], [1], [1], [0, 0, 0, 1, 1, 1], [0], [0]>} : vector<2x16x128xbf16>, vector<2x16x128xbf16>, vector<2x16x16xf32> -> vector<2x16x16xf32>
    "tpu.trace_stop"() : () -> ()
    %cst_11 = arith.constant 0.0883883461 : f32
    %16 = vector.broadcast %cst_11 : f32 to vector<2x16x16xf32>
    %17 = arith.mulf %15, %16 : vector<2x16x16xf32>
    %cst_12 = arith.constant dense<0xFF800000> : vector<2x16xf32>
    %18 = vector.multi_reduction <maximumf>, %17, %cst_12 [2] : vector<2x16x16xf32> to vector<2x16xf32>
    %19 = vector.shape_cast %18 : vector<2x16xf32> to vector<2x16x1xf32>
    %20 = vector.broadcast %19 : vector<2x16x1xf32> to vector<2x16x16xf32>
    %21 = arith.subf %17, %20 : vector<2x16x16xf32>
    %22 = math.exp %21 : vector<2x16x16xf32>
    %cst_13 = arith.constant dense<0.000000e+00> : vector<2x16xf32>
    %23 = vector.multi_reduction <add>, %22, %cst_13 [2] : vector<2x16x16xf32> to vector<2x16xf32>
    %24 = vector.shape_cast %23 : vector<2x16xf32> to vector<2x16x1xf32>
    %25 = tpu.reciprocal %24 {approx = true} : vector<2x16x1xf32> -> vector<2x16x1xf32>
    %26 = vector.broadcast %25 : vector<2x16x1xf32> to vector<2x16x16xf32>
    %27 = arith.mulf %22, %26 : vector<2x16x16xf32>
    %28 = arith.truncf %27 : vector<2x16x16xf32> to vector<2x16x16xbf16>
    "tpu.trace_start"() <{level = 10 : i32, message = "bml,ble->bme"}> : () -> ()
    %cst_14 = arith.constant dense<0.000000e+00> : vector<2x16x128xf32>
    %29 = tpu.matmul %28, %14, %cst_14 {dimension_numbers = #tpu.dot_dimension_numbers<[2], [1], [1], [2], [0, 0, 0, 1, 1, 2], [0], [0]>} : vector<2x16x16xbf16>, vector<2x16x128xbf16>, vector<2x16x128xf32> -> vector<2x16x128xf32>
    "tpu.trace_stop"() : () -> ()
    %30 = arith.truncf %29 : vector<2x16x128xf32> to vector<2x16x128xbf16>
    %31 = vector.shape_cast %30 : vector<2x16x128xbf16> to vector<32x128xbf16>
    %c0_15 = arith.constant 0 : index
    %c0_16 = arith.constant 0 : index
    %32 = vector.load %arg5[%c0_15, %c0_16] : memref<128x128xbf16, #tpu.memory_space<vmem>>, vector<128x128xbf16>
    %cst_17 = arith.constant dense<0.000000e+00> : vector<32x128xf32>
    %33 = tpu.matmul %31, %32, %cst_17 {dimension_numbers = #tpu.dot_dimension_numbers<[1], [0], [0], [1], [0, 0, 1, 1], [], []>} : vector<32x128xbf16>, vector<128x128xbf16>, vector<32x128xf32> -> vector<32x128xf32>
    %34 = vector.shape_cast %33 : vector<32x128xf32> to vector<2x16x128xf32>
    %35 = arith.extf %0 : vector<2x16x128xbf16> to vector<2x16x128xf32>
    %36 = arith.mulf %34, %35 : vector<2x16x128xf32>
    %cst_18 = arith.constant dense<0.000000e+00> : vector<2x16xf32>
    %37 = vector.multi_reduction <add>, %36, %cst_18 [2] : vector<2x16x128xf32> to vector<2x16xf32>
    %38 = arith.mulf %34, %34 : vector<2x16x128xf32>
    %cst_19 = arith.constant dense<0.000000e+00> : vector<2x16xf32>
    %39 = vector.multi_reduction <add>, %38, %cst_19 [2] : vector<2x16x128xf32> to vector<2x16xf32>
    %40 = arith.mulf %35, %35 : vector<2x16x128xf32>
    %cst_20 = arith.constant dense<0.000000e+00> : vector<2x16xf32>
    %41 = vector.multi_reduction <add>, %40, %cst_20 [2] : vector<2x16x128xf32> to vector<2x16xf32>
    %42 = arith.mulf %39, %41 : vector<2x16xf32>
    %c0_21 = arith.constant 0 : index
    %43 = memref.load %arg6[%c0_21] : memref<1xf32, #tpu.memory_space<smem>>
    %44 = vector.broadcast %43 : f32 to vector<2x16xf32>
    %45 = arith.mulf %44, %37 : vector<2x16xf32>
    %cst_22 = arith.constant 1.000000e-24 : f32
    %46 = vector.broadcast %cst_22 : f32 to vector<2x16xf32>
    %47 = arith.maximumf %42, %46 : vector<2x16xf32>
    %48 = math.rsqrt %47 : vector<2x16xf32>
    %49 = arith.mulf %45, %48 : vector<2x16xf32>
    %c0_23 = arith.constant 0 : index
    %50 = memref.load %arg7[%c0_23] : memref<1xf32, #tpu.memory_space<smem>>
    %51 = vector.broadcast %50 : f32 to vector<2x16xf32>
    %52 = arith.addf %49, %51 : vector<2x16xf32>
    %53 = tpu.iota {dimensions = array<i32: 0>} : vector<2x16xi32>
    %54 = tpu.iota {dimensions = array<i32: 1>} : vector<2x16xi32>
    %c2_i32 = arith.constant 2 : i32
    %55 = arith.muli %arg0, %c2_i32 : i32
    %56 = vector.broadcast %55 : i32 to vector<2x16xi32>
    %57 = arith.addi %56, %53 : vector<2x16xi32>
    %58 = arith.cmpi sge, %54, %57 : vector<2x16xi32>
    %c4_i32 = arith.constant 4 : i32
    %59 = vector.broadcast %c4_i32 : i32 to vector<2x16xi32>
    %60 = arith.addi %57, %59 : vector<2x16xi32>
    %61 = arith.cmpi slt, %54, %60 : vector<2x16xi32>
    %62 = arith.andi %58, %61 : vector<2x16xi1>
    %cst_24 = arith.constant 1.000000e+00 : f32
    %cst_25 = arith.constant -1.000000e+00 : f32
    %63 = vector.broadcast %cst_24 : f32 to vector<2x16xf32>
    %64 = vector.broadcast %cst_25 : f32 to vector<2x16xf32>
    %65 = arith.select %62, %63, %64 : vector<2x16xi1>, vector<2x16xf32>
    %66 = arith.mulf %65, %52 : vector<2x16xf32>
    %cst_26 = arith.constant 0.000000e+00 : f32
    %67 = vector.broadcast %cst_26 : f32 to vector<2x16xf32>
    %68 = arith.minimumf %66, %67 : vector<2x16xf32>
    %69 = math.absf %66 : vector<2x16xf32>
    %cst_27 = arith.constant 0.000000e+00 : f32
    %70 = vector.broadcast %cst_27 : f32 to vector<2x16xf32>
    %71 = arith.subf %70, %69 : vector<2x16xf32>
    %72 = math.exp %71 : vector<2x16xf32>
    %cst_28 = arith.constant 1.000000e+00 : f32
    %73 = vector.broadcast %cst_28 : f32 to vector<2x16xf32>
    %74 = arith.addf %73, %72 : vector<2x16xf32>
    %75 = math.log %74 : vector<2x16xf32>
    %76 = arith.subf %68, %75 : vector<2x16xf32>
    %cst_29 = arith.constant 0.000000e+00 : f32
    %77 = vector.broadcast %cst_29 : f32 to vector<2x16xf32>
    %78 = arith.subf %77, %76 : vector<2x16xf32>
    %c7_i32 = arith.constant 7 : i32
    %79 = vector.broadcast %c7_i32 : i32 to vector<2x16xi32>
    %80 = arith.cmpi slt, %54, %79 : vector<2x16xi32>
    %cst_30 = arith.constant 0.000000e+00 : f32
    %81 = vector.broadcast %cst_30 : f32 to vector<2x16xf32>
    %82 = arith.select %80, %78, %81 : vector<2x16xi1>, vector<2x16xf32>
    %83 = vector.shape_cast %82 : vector<2x16xf32> to vector<1x2x16xf32>
    %cst_31 = arith.constant dense<0.000000e+00> : vector<1xf32>
    %84 = vector.multi_reduction <add>, %83, %cst_31 [1, 2] : vector<1x2x16xf32> to vector<1xf32>
    %85 = vector.shape_cast %84 : vector<1xf32> to vector<1x1x1xf32>
    %86 = vector.extract %85[0, 0, 0] : f32 from vector<1x1x1xf32>
    %87 = vector.broadcast %86 : f32 to vector<1x8x128xf32>
    %c0_32 = arith.constant 0 : index
    %c0_33 = arith.constant 0 : index
    %c0_34 = arith.constant 0 : index
    %88 = vector.load %arg8[%c0_32, %c0_33, %c0_34] : memref<1x8x128xf32, #tpu.memory_space<vmem>>, vector<1x8x128xf32>
    tpu.vector_store %arg8[%c0_32, %c0_33, %c0_34], %87 {strides = array<i32>} : memref<1x8x128xf32, #tpu.memory_space<vmem>>, vector<1x8x128xf32>,
    return
  }
  func.func @transform_0(%arg0: i32) -> (i32, i32, i32) {
    %c0_i32 = arith.constant 0 : i32
    %c0_i32_0 = arith.constant 0 : i32
    %c0_i32_1 = arith.constant 0 : i32
    return %arg0, %c0_i32, %c0_i32_0 : i32, i32, i32
  }
  func.func @transform_1(%arg0: i32) -> (i32, i32, i32) {
    %c0_i32 = arith.constant 0 : i32
    %c0_i32_0 = arith.constant 0 : i32
    %c0_i32_1 = arith.constant 0 : i32
    return %arg0, %c0_i32, %c0_i32_0 : i32, i32, i32
  }
  func.func @transform_2(%arg0: i32) -> (i32, i32) {
    %c0_i32 = arith.constant 0 : i32
    %c0_i32_0 = arith.constant 0 : i32
    %c0_i32_1 = arith.constant 0 : i32
    return %c0_i32, %c0_i32_0 : i32, i32
  }
  func.func @transform_3(%arg0: i32) -> (i32, i32) {
    %c0_i32 = arith.constant 0 : i32
    %c0_i32_0 = arith.constant 0 : i32
    %c0_i32_1 = arith.constant 0 : i32
    return %c0_i32, %c0_i32_0 : i32, i32
  }
  func.func @transform_4(%arg0: i32) -> (i32, i32) {
    %c0_i32 = arith.constant 0 : i32
    %c0_i32_0 = arith.constant 0 : i32
    %c0_i32_1 = arith.constant 0 : i32
    return %c0_i32, %c0_i32_0 : i32, i32
  }
  func.func @transform_5(%arg0: i32) -> i32 {
    %c0_i32 = arith.constant 0 : i32
    %c0_i32_0 = arith.constant 0 : i32
    return %c0_i32 : i32
  }
  func.func @transform_6(%arg0: i32) -> i32 {
    %c0_i32 = arith.constant 0 : i32
    %c0_i32_0 = arith.constant 0 : i32
    return %c0_i32 : i32
  }
  func.func @transform_7(%arg0: i32) -> (i32, i32, i32) {
    %c0_i32 = arith.constant 0 : i32
    %c0_i32_0 = arith.constant 0 : i32
    %c0_i32_1 = arith.constant 0 : i32
    return %arg0, %c0_i32, %c0_i32_0 : i32, i32, i32
  }
}

</mosaic_0001>

<bundles_post_ra>
// kernel: tpu_custom_call.1
= control target key start
LH: loop header
LB: loop body
LE: loop exit
PB: predicated region body
PF: predicated region fallthrough
CT: control target
= control target key end

     0   :  { %s2261_s0 = inlined_call_operand.hbm [shape: bf16[4,16,128], index: 0, kind: input, shape index: {}]   ;;  %s2262_s1 = inlined_call_operand.hbm [shape: bf16[4,16,128], index: 1, kind: input, shape index: {}]   ;;  %s2263_s2 = inlined_call_operand.hbm [shape: bf16[128,128], index: 2, kind: input, shape index: {}]   ;;  %s2264_s3 = inlined_call_operand.hbm [shape: bf16[128,256], index: 3, kind: input, shape index: {}]   ;;  %s2265_s4 = inlined_call_operand.hbm [shape: bf16[128,128], index: 4, kind: input, shape index: {}]   ;;  %s2266_s5 = inlined_call_operand.<no memory space> [shape: f32[1], index: 5, kind: input, shape index: {}]   ;;  %s2267_s6 = inlined_call_operand.<no memory space> [shape: f32[1], index: 6, kind: input, shape index: {}]   ;;  %s2268_s7 = inlined_call_operand.hbm [shape: f32[2,8,128], index: 7, kind: output, shape index: {}]  }
   0x1   :  { %2276 = sst [smem:[#allocation20_spill]] %s2263_s2 }
   0x2   :  { %2277 = sst [smem:[#allocation21_spill]] %s2264_s3 }
   0x3   :  { %2278 = sst [smem:[#allocation22_spill]] %s2265_s4 }
   0x4   :  { %12 = sst [smem:[#allocation2]] %s2266_s5 }
   0x5   :  { %13 = sst [smem:[#allocation3]] %s2267_s6 }
   0x6   :  { %14 = vsyncpa [#allocation5], 0 }
   0x7   :  { %16 = vsyncpa [#allocation5 + $0x1], 0 }
   0x8   :  { %17 = vsyncpa [#allocation8], 0 }
   0x9   :  { %19 = vsyncpa [#allocation8 + $0x1], 0 }
   0xa   :  { %20 = vsyncpa [#allocation11], 0 }
   0xb   :  { %21 = vsyncpa [#allocation6], 0 }
   0xc   :  { %23 = vsyncpa [#allocation6 + $0x1], 0  ;;  %s1901_s28 = smov 0   ;;  %s1903_s29 = smov 0  }
   0xd   :  { %s1905_s30 = smov 0   ;;  %s1907_s8 = smov 0  }
   0xe LB: > { %s1922_s5 = sadd.s32 4294967295, %s1839_s8   ;;  %s1291_s6 = sadd.s32 4294967294, %s1839_s8   ;;  %s1839_s8 = sphi %s1907_s8, %s2305_s8   ;;  %s1835_s30 = sphi %s1905_s30, %s2304_s30   ;;  %s1831_s29 = sphi %s1903_s29, %s2303_s29   ;;  %s1827_s28 = sphi %s1901_s28, %s2302_s28  }
   0xf   : > { %p49_p0 = scmp.ne.s32.totalorder %s1831_s29, %s1827_s28  ;;  %p2269_p1 = scmp.eq.s32.totalorder %s1922_s5, 0 }
  0x10   : > { %p210_p3 = scmp.eq.s32.totalorder %s1291_s6, 1  ;;  %p1292_p5 = scmp.ge.s32.totalorder %s1839_s8, 1 }
  0x11   : > { %p1931_p4 = por %p2269_p1, %p49_p0  ;;  %p217_p7 = scmp.lt.s32.totalorder %s1839_s8, 3 }
  0x12   : > { %p1936_p6 = por %p210_p3, %p49_p0  ;;  %s1841_s12 = smov [#allocation9]  }
  0x13   : > { %s2279_s9 = scalar_select %p1931_p4, 1, 0 }
  0x14   : > { %s2280_s10 = scalar_select %p1936_p6, 1, 0 }
  0x15   : > { %p1941_p8 = pnand %p1292_p5, %p217_p7  ;;  %s229_s13 = sshll.u32 %s1841_s12, 4  ;;  %s1945_s13 = int_to_ptr.vmem [resolvable:$true] %s229_s13 }
  0x16   : > { %s1842_s15 = smov [#allocation10]   ;;  %s2283_s2 = sld [smem:[#allocation20_spill]] }
  0x17   : > { %s2281_s11 = scalar_select %p1941_p8, 1, 0 }
  0x18   : > { %p1471_p9 = pneg %p1941_p8  ;;  %s242_s16 = sshll.u32 %s1842_s15, 4  ;;  %s1956_s16 = int_to_ptr.vmem [resolvable:$true] %s242_s16 }
  0x1a   : > { %p1952_p11 = pnand %p1471_p9, %p2269_p1 }
  0x1c   : > { %s1617_s19 = scalar_lea.hbm %s2283_s2, 1024  ;;  %p1966_p13 = pneg %p1952_p11 }
  0x1d   : > { %p1618_p12 = scmp.ne.s32.totalorder %s2283_s2, %s1617_s19  ;;  %p1624_p5 = scmp.lt.u32.totalorder %s1617_s19, %s2283_s2 }
  0x1f   : > { %p1620_p0 = pnand %p1966_p13, %p1618_p12 }
  0x21   : > { %p1621_p3 = pneg %p1620_p0 }
  0x23   : > { %p1626_p7 = pnand %p1624_p5, %p1621_p3 }
  0x25   : > { %1629 = shalt.err (!%p1626_p7)
}
  0x26   : > { %s1630_s25 = scalar_lea.vmem %s1945_s13, 1024  ;;  %p1638_p2 = scmp.lt.s32.totalorder %s1945_s13, %s1945_s13 }
  0x27   : > { %p1631_p9 = scmp.ne.s32.totalorder %s1945_s13, %s1630_s25  ;;  %p1639_p6 = scmp.lt.s32.totalorder %s1630_s25, %s1630_s25 }
  0x29   : > { %p1633_p10 = pnand %p1631_p9, %p1966_p13  ;;  %p1640_p12 = por %p1639_p6, %p1638_p2 }
  0x2b   : > { %p1634_p1 = pneg %p1633_p10 }
  0x2d   : > { %p1641_p0 = pnand %p1640_p12, %p1634_p1 }
  0x2f   : > { %1644 = shalt.err (!%p1641_p0)
}
  0x30   : > { %s2270_s26 = smov 64   ;;  %s2272_s27 = smov 4  }
  0x31   : > { %1474 = dma.hbm_to_vmem [thread:$0]  (!%p1952_p11), %s2283_s2, 1024, %s1945_s13, [#allocation8], %s2270_s26, %s2270_s26, %s2272_s27  }
  0x32   : > { %s2285_s3 = sld [smem:[#allocation21_spill]] }
  0x38   : > { %s1645_s18 = scalar_lea.hbm %s2285_s3, 2048 }
  0x39   : > { %p1646_p1 = scmp.ne.s32.totalorder %s2285_s3, %s1645_s18  ;;  %p1652_p10 = scmp.lt.u32.totalorder %s1645_s18, %s2285_s3 }
  0x3b   : > { %p1648_p2 = pnand %p1646_p1, %p1966_p13 }
  0x3d   : > { %p1649_p6 = pneg %p1648_p2 }
  0x3f   : > { %p1654_p3 = pnand %p1652_p10, %p1649_p6 }
  0x41   : > { %1657 = shalt.err (!%p1654_p3)
}
  0x42   : > { %s1658_s13 = scalar_lea.vmem %s1956_s16, 2048  ;;  %p1666_p12 = scmp.lt.s32.totalorder %s1956_s16, %s1956_s16 }
  0x43   : > { %p1659_p5 = scmp.ne.s32.totalorder %s1956_s16, %s1658_s13  ;;  %p1667_p0 = scmp.lt.s32.totalorder %s1658_s13, %s1658_s13 }
  0x45   : > { %p1661_p7 = pnand %p1659_p5, %p1966_p13  ;;  %p1668_p1 = por %p1667_p0, %p1666_p12 }
  0x47   : > { %p1662_p9 = pneg %p1661_p7 }
  0x49   : > { %p1669_p2 = pnand %p1668_p1, %p1662_p9 }
  0x4b   : > { %1672 = shalt.err (!%p1669_p2)
}
  0x4c   : > { %s1845_s24 = smov 128   ;;  %s1846_s25 = smov 8  }
  0x4d   : > { %1477 = dma.hbm_to_vmem [thread:$0]  (!%p1952_p11), %s2285_s3, 2048, %s1956_s16, [#allocation11], %s1845_s24, %s1845_s24, %s1846_s25  }
  0x4e   : > { %s1847_s15 = smov [#allocation12]   ;;  %s2014_s18 = sadd.s32 1, %s1839_s8  }
  0x4f   : > { %s255_s17 = sshll.u32 %s1847_s15, 4  ;;  %s2286_s4 = sld [smem:[#allocation22_spill]]  ;;  %s256_s17 = int_to_ptr.vmem [resolvable:$true] %s255_s17 }
  0x55   : > { %s1673_s21 = scalar_lea.hbm %s2286_s4, 1024 }
  0x56   : > { %p1674_p6 = scmp.ne.s32.totalorder %s2286_s4, %s1673_s21  ;;  %p1680_p5 = scmp.lt.u32.totalorder %s1673_s21, %s2286_s4 }
  0x58   : > { %p1676_p10 = pnand %p1674_p6, %p1966_p13 }
  0x5a   : > { %p1677_p3 = pneg %p1676_p10 }
  0x5c   : > { %p1682_p7 = pnand %p1680_p5, %p1677_p3 }
  0x5e   : > { %1685 = shalt.err (!%p1682_p7)
}
  0x5f   : > { %s1686_s16 = scalar_lea.vmem %s256_s17, 1024  ;;  %p1694_p1 = scmp.lt.s32.totalorder %s256_s17, %s256_s17 }
  0x60   : > { %p1687_p9 = scmp.ne.s32.totalorder %s256_s17, %s1686_s16  ;;  %p1695_p2 = scmp.lt.s32.totalorder %s1686_s16, %s1686_s16 }
  0x62   : > { %p1689_p12 = pnand %p1687_p9, %p1966_p13  ;;  %p1696_p4 = por %p1695_p2, %p1694_p1 }
  0x64   : > { %p1690_p0 = pneg %p1689_p12 }
  0x66   : > { %p1697_p8 = pnand %p1696_p4, %p1690_p0 }
  0x68   : > { %1700 = shalt.err (!%p1697_p8)
}
  0x69   : > { %s2287_s24 = smov 4   ;;  %s2288_s25 = smov 64  }
  0x6a   : > { %1480 = dma.hbm_to_vmem [thread:$0]  (!%p1952_p11), %s2286_s4, 1024, %s256_s17, [#allocation11], %s2288_s25, %s2288_s25, %s2287_s24  }
  0x6b   : > { %s33_s22 = ssub.s32 %s1839_s8, %s2014_s18  ;;  %s36_s14 = sadd.s32 1, %s1835_s30 }
  0x6c   : > { %p34_p4 = scmp.eq.s32.totalorder %s33_s22, 0  ;;  %p43_p8 = scmp.ne.s32.totalorder %s1835_s30, %s1831_s29 }
  0x6d   : > { %p44_p13 = scmp.eq.s32.totalorder %s1839_s8, 0  ;;  %p1495_p6 = scmp.lt.s32.totalorder %s1839_s8, 2 }
  0x6e   : > { %s2045_s6 = scalar_select %p34_p4, %s1835_s30, %s36_s14  }
  0x6f   : > { %p45_p10 = por %p44_p13, %p43_p8  ;;  %p2290_p3 = scmp.eq.s32.totalorder %s1922_s5, 1 }
  0x70   : > { %2289 = sst [smem:[#allocation19_spill]] %s2045_s6  ;;  %s275_s15 = sand.u32 1, %s1835_s30  }
  0x71   : > { %p2049_p5 = por %p2290_p3, %p43_p8  ;;  %s1356_s19 = sshll.u32 %s1839_s8, 8 }
  0x72   : > { %s2055_s20 = sshll.u32 %s275_s15, 4  ;;  %s2060_s23 = scalar_lea.hbm %s2261_s0, %s1356_s19 }
  0x73   : > { %s279_s13 = scalar_lea.vmem [#allocation4], %s2055_s20  ;;  %p2063_p11 = pnand %p1495_p6, %p45_p10 }
  0x74   : > { %s287_s16 = sshll.u32 %s279_s13, 4  ;;  %s2072_s14 = scalar_lea.hbm %s2262_s1, %s1356_s19  ;;  %s2067_s16 = int_to_ptr.vmem [resolvable:$true] %s287_s16 }
  0x75   : > { %s2074_s21 = scalar_lea.sflag [#allocation5], %s275_s15  ;;  %s1701_s17 = scalar_lea.hbm %s2060_s23, 256 }
  0x76   : > { %p1702_p7 = scmp.ne.s32.totalorder %s2060_s23, %s1701_s17  ;;  %p1703_p9 = pneg %p2063_p11 }
  0x77   : > { %s1706_s3 = scalar_lea.hbm %s2261_s0, 512  ;;  %p1707_p1 = scmp.lt.u32.totalorder %s2060_s23, %s2261_s0 }
  0x78   : > { %p1704_p12 = pnand %p1703_p9, %p1702_p7  ;;  %p1708_p2 = scmp.lt.u32.totalorder %s1706_s3, %s1701_s17 }
  0x79   : > { %p1710_p8 = scmp.lt.u32.totalorder %s1701_s17, %s2060_s23 }
  0x7a   : > { %p1705_p0 = pneg %p1704_p12  ;;  %p1709_p4 = por %p1708_p2, %p1707_p1 }
  0x7c   : > { %p1711_p13 = por %p1710_p8, %p1709_p4 }
  0x7e   : > { %p1712_p6 = pnand %p1711_p13, %p1705_p0 }
  0x80   : > { %1715 = shalt.err (!%p1712_p6)
}
  0x81   : > { %s1716_s15 = scalar_lea.vmem %s2067_s16, 256  ;;  %s1848_s2 = smov [#allocation4]  }
  0x82   : > { %p1717_p10 = scmp.ne.s32.totalorder %s2067_s16, %s1716_s15  ;;  %s1721_s19 = sshll.u32 %s1848_s2, 4  ;;  %s1722_s19 = int_to_ptr.vmem [resolvable:$false] %s1721_s19 }
  0x83   : > { %s1723_s4 = scalar_lea.vmem %s1722_s19, 512  ;;  %p1724_p12 = scmp.lt.s32.totalorder %s2067_s16, %s1722_s19 }
  0x84   : > { %p1719_p3 = pnand %p1717_p10, %p1703_p9  ;;  %p1725_p1 = scmp.lt.s32.totalorder %s1723_s4, %s1716_s15 }
  0x86   : > { %p1720_p7 = pneg %p1719_p3  ;;  %p1726_p2 = por %p1725_p1, %p1724_p12 }
  0x88   : > { %p1727_p4 = pnand %p1726_p2, %p1720_p7 }
  0x8a   : > { %1730 = shalt.err (!%p1727_p4)
}
  0x8b   : > { %1484 = dma.hbm_to_vmem [thread:$0]  (!%p2063_p11), %s2060_s23, 256, %s2067_s16, %s2074_s21, %s2288_s25, %s2288_s25, %s2287_s24  }
  0x8c   : > { %s301_s3 = scalar_lea.vmem [#allocation7], %s2055_s20  ;;  %s297_s27 = sand.u32 1, %s1839_s8  }
  0x8d   : > { %s309_s6 = sshll.u32 %s301_s3, 4  ;;  %s2109_s22 = scalar_lea.sflag [#allocation8], %s297_s27  ;;  %s2107_s6 = int_to_ptr.vmem [resolvable:$true] %s309_s6 }
  0x8e   : > { %s1731_s17 = scalar_lea.hbm %s2072_s14, 256  ;;  %s1736_s2 = scalar_lea.hbm %s2262_s1, 512 }
  0x8f   : > { %p1732_p0 = scmp.ne.s32.totalorder %s2072_s14, %s1731_s17  ;;  %p1737_p6 = scmp.lt.u32.totalorder %s2072_s14, %s2262_s1 }
  0x90   : > { %p1738_p10 = scmp.lt.u32.totalorder %s1736_s2, %s1731_s17  ;;  %p1740_p7 = scmp.lt.u32.totalorder %s1731_s17, %s2072_s14 }
  0x91   : > { %p1734_p8 = pnand %p1732_p0, %p1703_p9 }
  0x92   : > { %p1739_p3 = por %p1738_p10, %p1737_p6 }
  0x93   : > { %p1735_p13 = pneg %p1734_p8 }
  0x94   : > { %p1741_p12 = por %p1740_p7, %p1739_p3 }
  0x96   : > { %p1742_p1 = pnand %p1741_p12, %p1735_p13 }
  0x98   : > { %1745 = shalt.err (!%p1742_p1)
}
  0x99   : > { %s1746_s20 = scalar_lea.vmem %s2107_s6, 256  ;;  %s1849_s23 = smov [#allocation7]  }
  0x9a   : > { %p1747_p2 = scmp.ne.s32.totalorder %s2107_s6, %s1746_s20  ;;  %s1751_s16 = sshll.u32 %s1849_s23, 4  ;;  %s1752_s16 = int_to_ptr.vmem [resolvable:$false] %s1751_s16 }
  0x9b   : > { %s1753_s21 = scalar_lea.vmem %s1752_s16, 512  ;;  %p1754_p8 = scmp.lt.s32.totalorder %s2107_s6, %s1752_s16 }
  0x9c   : > { %p1749_p4 = pnand %p1747_p2, %p1703_p9  ;;  %p1755_p6 = scmp.lt.s32.totalorder %s1753_s21, %s1746_s20 }
  0x9e   : > { %p1750_p0 = pneg %p1749_p4  ;;  %p1756_p10 = por %p1755_p6, %p1754_p8 }
  0xa0   : > { %p1757_p3 = pnand %p1756_p10, %p1750_p0 }
  0xa2   : > { %1760 = shalt.err (!%p1757_p3)
}
  0xa3   : > { %1487 = dma.hbm_to_vmem [thread:$0]  (!%p2063_p11), %s2072_s14, 256, %s2107_s6, %s2109_s22, %s2288_s25, %s2288_s25, %s2287_s24  }
  0xa4   : > { %p2293_p9 = scmp.ne.s32.totalorder %s2281_s11, 0 }
  0xa5   : > { %s2141_s3 = sand.u32 (!%p2293_p9), 1, %s1831_s29   ;;  %p2294_p13 = scmp.ne.s32.totalorder (!%p2293_p9), %s2279_s9, 0 }
  0xa6   : > { %321 = sbr.rel (%p2293_p9) target bundleno = 1846 (0x736), region = 48  ;;  %s1306_s27 = sshll.u32 (!%p2293_p9), %s2141_s3, 4 }
  0xa7   : > { %s324_s17 = scalar_lea.sflag (!%p2293_p9), [#allocation5], %s2141_s3  ;;  %s2145_s13 = scalar_lea.vmem (!%p2293_p9), [#allocation4], %s1306_s27 }
  0xad   : > { %1806 = dma.done.wait (%p2294_p13), %s324_s17, 256  }
  0xae   : > { %1808 = vsyncadd (%p2294_p13), %s324_s17, 4294967040  ;;  %s332_s24 = sand.u32 1, %s1922_s5   ;;  %s2152_s25 = scalar_lea.vmem [#allocation7], %s1306_s27 }
  0xaf   : > { %s333_s11 = scalar_lea.sflag [#allocation8], %s332_s24 }
  0xb0   : > { %1810 = dma.done.wait (%p2294_p13), %s333_s11, 256  }
  0xb1   : > { %1812 = vsyncadd (%p2294_p13), %s333_s11, 4294967040  ;;  %p2295_p11 = scmp.eq.s32.totalorder %s1922_s5, 0 }
  0xb3   : > { %1814 = dma.done.wait (%p2295_p11), [#allocation8], 1024   ;;  %p2296_p7 = pmov %p2295_p11 }
  0xb5   : > { %1816 = vsyncadd (%p2296_p7), [#allocation8], 4294966272  ;;  %p2297_p12 = pmov %p2296_p7 }
  0xb6   : > { %p2298_p1 = pmov %p2296_p7 }
  0xb7   : > { %1818 = dma.done.wait (%p2297_p12), [#allocation11], 3072  }
  0xb8   : > { %1820 = vsyncadd (%p2298_p1), [#allocation11], 4294964224  ;;  %v1850_v0 = vmov 0   ;;  %v1543_v1 = vld [vmem:[#allocation10 + $0x4] ss:$8 sps:$4 sm:$0xff]   ;;  %v1554_v8 = vld [vmem:[#allocation9 + $0x10] sm:$0xff]  }
  0xb9   : > { %662 = vmatprep.mubr.bf16.mxu1 %v1850_v0  ;;  %v1545_v2 = vld [vmem:[#allocation10] ss:$8 sps:$4 sm:$0xff]   ;;  %630 = vmatprep.subr.bf16.mxu1 %v1543_v1  ;;  %v1547_v4 = vld [vmem:[#allocation10 + $0x14] ss:$8 sps:$4 sm:$0xff]   ;;  %v1549_v5 = vld [vmem:[#allocation10 + $0x10] ss:$8 sps:$4 sm:$0xff]  }
  0xba   : > { %v1546_v3 = vld [vmem:[#allocation9] sm:$0xff]   ;;  %631 = vmatpush1.bf16.msra.mxu1 %v1545_v2  ;;  %v1550_v6 = vld [vmem:[#allocation9 + $0x8] sm:$0xff]   ;;  %v1555_v10 = vld [vmem:[#allocation10 + $0x34] ss:$8 sps:$4 sm:$0xff]   ;;  %v1851_v29 = vmov 0.0   ;;  %vm1852_vm0 = vmmov 0  }
  0xbb   : > { %1387 = vmatprep.subr.bf16.mxu0 %v1546_v3  ;;  %632 = vmatprep.subr.bf16.mxu1 %v1547_v4  ;;  %v1551_v7 = vld [vmem:[#allocation10 + $0x24] ss:$8 sps:$4 sm:$0xff]   ;;  %v1553_v9 = vld [vmem:[#allocation10 + $0x20] ss:$8 sps:$4 sm:$0xff]   ;;  %v1558_v11 = vld [vmem:[#allocation9 + $0x18] sm:$0xff]   ;;  %vm773_vm1 = vcmask 130048  }
  0xbc   : > { %1388 = vmatpush3.bf16.msra.mxu0 %v1546_v3  ;;  %v1557_v12 = vld [vmem:[#allocation10 + $0x30] ss:$8 sps:$4 sm:$0xff]   ;;  %v1559_v13 = vld [vmem:[#allocation10 + $0x44] ss:$8 sps:$4 sm:$0xff]   ;;  %v1561_v15 = vld [vmem:[#allocation10 + $0x40] ss:$8 sps:$4 sm:$0xff]  }
  0xbd   : > { %1389 = vmatprep.subr.bf16.mxu0 %v1550_v6  ;;  %v1562_v14 = vld [vmem:[#allocation9 + $0x20] sm:$0xff]   ;;  %v1563_v16 = vld [vmem:[#allocation10 + $0x54] ss:$8 sps:$4 sm:$0xff]   ;;  %v1566_v17 = vld [vmem:[#allocation9 + $0x28] sm:$0xff]   ;;  %s1067_s9 = sld [smem:[#allocation2]]  ;;  %s1350_s26 = sshll.u32 %s1922_s5, 1 }
  0xbe   : > { %633 = vmatpush1.bf16.msra.mxu1 %v1549_v5  ;;  %v1565_v18 = vld [vmem:[#allocation10 + $0x50] ss:$8 sps:$4 sm:$0xff]   ;;  %v1567_v20 = vld [vmem:[#allocation10 + $0x64] ss:$8 sps:$4 sm:$0xff]   ;;  %v1569_v21 = vld [vmem:[#allocation10 + $0x60] ss:$8 sps:$4 sm:$0xff]  }
  0xbf   : > { %634 = vmatprep.subr.bf16.mxu1 %v1551_v7  ;;  %v2167_v19 = vld [vmem:[%s2145_s13] sm:$0xff]   ;;  %v1574_v24 = vld [vmem:[#allocation9 + $0x38] sm:$0xff]   ;;  %s1085_s14 = sld [smem:[#allocation3]]  ;;  %vm1116_vm5 = vcmask 130112   ;;  %vm1127_vm6 = vcmask 1041409   ;;  %vm1143_vm8 = vcmask 123904  }
  0xc0   : > { %1390 = vmatpush3.bf16.msra.mxu0 %v1550_v6  ;;  %v1570_v22 = vld [vmem:[#allocation9 + $0x30] sm:$0xff]   ;;  %1403 = vmatprep.mubr.bf16.mxu0 %v2167_v19  ;;  %v2171_v26 = vld [vmem:[%s2145_s13 + $0x8] sm:$0xff]   ;;  %s1311_s6 = sshll.u32 %s2141_s3, 3  ;;  %s1352_s2 = sshll.u32 %s1922_s5, 7 }
  0xc1   : > { %1391 = vmatprep.subr.bf16.mxu0 %v1554_v8  ;;  %v1571_v23 = vld [vmem:[#allocation10 + $0x74] ss:$8 sps:$4 sm:$0xff]   ;;  %v1573_v25 = vld [vmem:[#allocation10 + $0x70] ss:$8 sps:$4 sm:$0xff]   ;;  %s383_s22 = scalar_lea.vmem [#allocation13], %s1311_s6  ;;  %s2219_s23 = scalar_lea.hbm %s2268_s7, %s1352_s2 }
  0xc2   : > { %635 = vmatpush1.bf16.msra.mxu1 %v1553_v9  ;;  %v1575_v27 = vld [vmem:[%s2152_s25] sm:$0xff]   ;;  %v1578_v28 = vld [vmem:[%s2152_s25 + $0x8] sm:$0xff]   ;;  %s1170_s15 = sshll.u32 %s383_s22, 4  ;;  %s1157_s16 = scalar_lea.sflag [#allocation6], %s2141_s3  ;;  %s2214_s15 = int_to_ptr.vmem [resolvable:$true] %s1170_s15 }
  0xc3   : > { %636 = vmatprep.subr.bf16.mxu1 %v1555_v10  ;;  %s1761_s21 = scalar_lea.vmem %s2214_s15, 128  ;;  %s1854_s5 = smov [#allocation13]  }
  0xc4   : > { %1392 = vmatpush3.bf16.msra.mxu0 %v1554_v8  ;;  %p1762_p2 = scmp.ne.s32.totalorder %s2214_s15, %s1761_s21  ;;  %s1765_s27 = sshll.u32 %s1854_s5, 4  ;;  %s1766_s27 = int_to_ptr.vmem [resolvable:$false] %s1765_s27 }
  0xc5   : > { %1393 = vmatprep.subr.bf16.mxu0 %v1558_v11  ;;  %s1767_s17 = scalar_lea.vmem %s1766_s27, 256  ;;  %p1768_p8 = scmp.lt.s32.totalorder %s2214_s15, %s1766_s27 }
  0xc6   : > { %637 = vmatpush1.bf16.msra.mxu1 %v1557_v12  ;;  %p1763_p4 = pnand %p1762_p2, %p2049_p5  ;;  %p1769_p6 = scmp.lt.s32.totalorder %s1767_s17, %s1761_s21 }
  0xc7   : > { %638 = vmatprep.subr.bf16.mxu1 %v1559_v13 }
  0xc8   : > { %1394 = vmatpush3.bf16.msra.mxu0 %v1558_v11  ;;  %p1764_p0 = pneg %p1763_p4  ;;  %p1770_p10 = por %p1769_p6, %p1768_p8 }
  0xc9   : > { %1395 = vmatprep.subr.bf16.mxu0 %v1562_v14 }
  0xca   : > { %639 = vmatpush1.bf16.msra.mxu1 %v1561_v15  ;;  %p1771_p3 = pnand %p1770_p10, %p1764_p0 }
  0xcb   : > { %640 = vmatprep.subr.bf16.mxu1 %v1563_v16 }
  0xcc   : > { %1396 = vmatpush3.bf16.msra.mxu0 %v1562_v14 }
  0xcd   : > { %1397 = vmatprep.subr.bf16.mxu0 %v1566_v17 }
  0xce   : > { %641 = vmatpush1.bf16.msra.mxu1 %v1565_v18 }
  0xcf   : > { %642 = vmatprep.subr.bf16.mxu1 %v1567_v20 }
  0xd0   : > { %1398 = vmatpush3.bf16.msra.mxu0 %v1566_v17 }
  0xd1   : > { %1399 = vmatprep.subr.bf16.mxu0 %v1570_v22 }
  0xd2   : > { %643 = vmatpush1.bf16.msra.mxu1 %v1569_v21  ;;  %v1579_v21 = vld [vmem:[#allocation12] sm:$0xff]  }
  0xd3   : > { %644 = vmatprep.subr.bf16.mxu1 %v1571_v23  ;;  %v1581_v23 = vld [vmem:[#allocation12 + $0x10] sm:$0xff]  }
  0xd4   : > { %1400 = vmatpush3.bf16.msra.mxu0 %v1570_v22  ;;  %v1580_v22 = vld [vmem:[#allocation12 + $0x8] sm:$0xff]  }
  0xd5   : > { %1401 = vmatprep.subr.bf16.mxu0 %v1574_v24 }
  0xd6   : > { %645 = vmatpush1.bf16.msra.mxu1 %v1573_v25  ;;  %v1583_v25 = vld [vmem:[#allocation12 + $0x20] sm:$0xff]  }
  0xd7   : > { %1431 = vmatprep.subr.bf16.mxu1 %v1579_v21 }
  0xd8   : > { %1402 = vmatpush3.bf16.msra.mxu0 %v1574_v24  ;;  %v1582_v24 = vld [vmem:[#allocation12 + $0x18] sm:$0xff]  }
  0xd9   : > { %663 = vmatmul.mubr.bf16.vlgmr.msra.gmra.mrb[0].mxu1 %v1575_v27  ;;  %1407 = vmatprep.subr.bf16.mxu0 %v1851_v29 }
  0xda   : > { %672 = vmatprep.mubr.bf16.mxu1 %v1850_v0  ;;  %1432 = vmatpush3.bf16.msra.mxu1 %v1579_v21 }
  0xdb   : > { %1404 = vmatmul.mubr.bf16.vlgmr.msra.gmra.mrb[0].mxu0 %v2171_v26  ;;  %1433 = vmatprep.subr.bf16.mxu1 %v1580_v22 }
  0xdc   : > { %1409 = vmatprep.mubr.msk.bf16.mxu0 %vm1852_vm0, %v1851_v29 }
  0xde   : > { %1434 = vmatpush3.bf16.msra.mxu1 %v1580_v22 }
  0xdf   : > { %1435 = vmatprep.subr.bf16.mxu1 %v1581_v23 }
  0xe1   : > { %673 = vmatmul.mubr.bf16.gmra.mrb[4].mxu1 %v1578_v28 }
  0xe2   : > { %1436 = vmatpush3.bf16.msra.mxu1 %v1581_v23 }
  0xe3   : > { %1437 = vmatprep.subr.bf16.mxu1 %v1582_v24 }
  0xe6   : > { %1438 = vmatpush3.bf16.msra.mxu1 %v1582_v24  ;;  %v1091_v24 = vlaneseq }
  0xe7   : > { %1439 = vmatprep.subr.bf16.mxu1 %v1583_v25 }
  0xea   : > { %1440 = vmatpush3.bf16.msra.mxu1 %v1583_v25 }
 0x1ac   : > { %v664_v30 = vpop.f32.mrb[0].mxu1 }
 0x1ad   : > { %v666_v31 = vpop.f32.mrb[1].mxu1 }
 0x1ae   : > { %v668_v32 = vpop.f32.mrb[2].mxu1  ;;  %v1405_v33 = vpop.f32.mrb[0].mxu0 }
 0x1af   : > { %v683_v34 = vpack.c.bf16 %v668_v32, %v664_v30  ;;  %v670_v35 = vpop.f32.mrb[3].mxu1  ;;  %v505_v36 = vpop.f32.mrb[1].mxu0 }
 0x1b0   : > { %v684_v37 = vpack.c.bf16 %v670_v35, %v666_v31  ;;  %v1406_v38 = vpop.f32.mrb[2].mxu0 }
 0x1b1   : > { %1408 = vmatpush3.bf16.xpose.msra.mxu0 %v683_v34  ;;  %v521_v39 = vpack.c.bf16 %v1406_v38, %v1405_v33  ;;  %v508_v40 = vpop.f32.mrb[3].mxu0 }
 0x1b2   : > { %v520_v41 = vpack.c.bf16 %v508_v40, %v505_v36  ;;  %1413 = vmatprep.subr.bf16.mxu0 %v1851_v29 }
 0x1b4   : > { %v674_v42 = vpop.f32.mrb[4].mxu1 }
 0x1b5   : > { %v2180_v43 = vpop.f32.mrb[5].mxu1 }
 0x1b6   : > { %v678_v44 = vpop.f32.mrb[6].mxu1 }
 0x1b7   : > { %v685_v45 = vpack.c.bf16 %v678_v44, %v674_v42  ;;  %v2182_v46 = vpop.f32.mrb[7].mxu1  ;;  %v1584_v42 = vld [vmem:[#allocation12 + $0x28] sm:$0xff]   ;;  %v1585_v44 = vld [vmem:[#allocation12 + $0x30] sm:$0xff]  }
 0x1b8   : > { %v686_v47 = vpack.c.bf16 %v2182_v46, %v2180_v43  ;;  %1410 = vmatmul.mubr.bf16.vlgmr.msra.gmra.mrb[4].mxu0 %v520_v41  ;;  %1441 = vmatprep.subr.bf16.mxu1 %v1584_v42 }
 0x1b9   : > { %1414 = vmatpush3.bf16.xpose.msra.mxu0 %v685_v45  ;;  %1415 = vmatprep.mubr.msk.bf16.mxu0 %vm1852_vm0, %v1851_v29  ;;  %v1586_v45 = vld [vmem:[#allocation12 + $0x38] sm:$0xff]  }
 0x1ba   : > { %1419 = vmatprep.subr.bf16.mxu0 %v1851_v29  ;;  %1442 = vmatpush3.bf16.msra.mxu1 %v1584_v42 }
 0x1bb   : > { %1443 = vmatprep.subr.bf16.mxu1 %v1585_v44 }
 0x1be   : > { %1444 = vmatpush3.bf16.msra.mxu1 %v1585_v44 }
 0x1bf   : > { %1445 = vmatprep.subr.bf16.mxu1 %v1586_v45 }
 0x1c0   : > { %1416 = vmatmul.mubr.bf16.vlgmr.msra.gmra.mrb[8].mxu0 %v521_v39 }
 0x1c1   : > { %1420 = vmatpush3.bf16.msra.mxu0 %v684_v37  ;;  %1421 = vmatprep.mubr.msk.bf16.mxu0 %vm1852_vm0, %v1851_v29 }
 0x1c2   : > { %1425 = vmatprep.subr.bf16.mxu0 %v1851_v29  ;;  %1446 = vmatpush3.bf16.msra.mxu1 %v1586_v45 }
 0x28b   : > { %v721_v48 = vpop.f32.mrb[4].mxu0 }
 0x28c   : > { %v769_v49 = vmul.f32 0.088388346, %v721_v48  ;;  %v1411_v50 = vpop.f32.mrb[5].mxu0  ;;  %v1023_v48 = vunpack.c.l.bf16 %v2167_v19 }
 0x28d   : > { %v724_v51 = vpop.f32.mrb[6].mxu0 }
 0x28e   : > { %v770_v52 = vmul.f32 0.088388346, %v724_v51  ;;  %v1412_v53 = vpop.f32.mrb[7].mxu0  ;;  %v774_v54 = vsel %vm773_vm1, %v769_v49, -inf  ;;  %v1051_v43 = vmul.f32 %v1023_v48, %v1023_v48 }
 0x28f   : > { %775 = vmax.xlane.f32.xlu0 %v774_v54 }
 0x290   : > { %v777_v55 = vsel %vm773_vm1, %v770_v52, -inf }
 0x293   : > { %778 = vmax.xlane.f32.xlu0 %v777_v55  ;;  %v762_v56 = vpop.f32.mrb[8].mxu0 }
 0x294   : > { %v771_v57 = vmul.f32 0.088388346, %v762_v56  ;;  %v1417_v58 = vpop.f32.mrb[9].mxu0  ;;  %v1024_v56 = vunpack.c.h.bf16 %v2167_v19 }
 0x295   : > { %v765_v59 = vpop.f32.mrb[10].mxu0 }
 0x296   : > { %v772_v60 = vmul.f32 0.088388346, %v765_v59  ;;  %v1418_v61 = vpop.f32.mrb[11].mxu0  ;;  %v780_v62 = vsel %vm773_vm1, %v771_v57, -inf }
 0x297   : > { %781 = vmax.xlane.f32.xlu1 %v780_v62 }
 0x298   : > { %v783_v63 = vsel %vm773_vm1, %v772_v60, -inf }
 0x29b   : > { %784 = vmax.xlane.f32.xlu1 %v783_v63 }
 0x31c   : > { %v776_v0 = vpop.xlane.xlu0 %775 }
 0x31d   : > { %v786_v1 = vsub.f32 %v769_v49, %v776_v0 }
 0x31f   : > { %v790_v2 = vmul.f32 1.442695, %v786_v1  ;;  %v1025_v1 = vunpack.c.l.bf16 %v2171_v26 }
 0x320   : > { %v779_v3 = vpop.xlane.xlu0 %778 }
 0x321   : > { %1589 = vpow2.f32 %v790_v2  ;;  %v787_v4 = vsub.f32 %v770_v52, %v779_v3  ;;  %v1053_v3 = vmul.f32 %v1025_v1, %v1025_v1 }
 0x323   : > { %v792_v5 = vmul.f32 1.442695, %v787_v4  ;;  %v1026_v4 = vunpack.c.h.bf16 %v2171_v26 }
 0x324   : > { %v782_v6 = vpop.xlane.xlu1 %781 }
 0x325   : > { %1591 = vpow2.f32 %v792_v5  ;;  %v788_v7 = vsub.f32 %v771_v57, %v782_v6  ;;  %v1052_v57 = vmul.f32 %v1024_v56, %v1024_v56  ;;  %v1054_v19 = vmul.f32 %v1026_v4, %v1026_v4 }
 0x327   : > { %v794_v8 = vmul.f32 1.442695, %v788_v7 }
 0x328   : > { %v785_v9 = vpop.xlane.xlu1 %784 }
 0x329   : > { %1593 = vpow2.f32 %v794_v8  ;;  %v789_v10 = vsub.f32 %v772_v60, %v785_v9 }
 0x32b   : > { %v1590_v11 = vpop.eup %1589  ;;  %v796_v12 = vmul.f32 1.442695, %v789_v10 }
 0x32c   : > { %v798_v13 = vsel %vm773_vm1, %v1590_v11, 0.0 }
 0x32d   : > { %1595 = vpow2.f32 %v796_v12  ;;  %799 = vadd.xlane.f32.xlu0 %v798_v13 }
 0x32f   : > { %v1592_v14 = vpop.eup %1591 }
 0x330   : > { %v801_v15 = vsel %vm773_vm1, %v1592_v14, 0.0 }
 0x331   : > { %802 = vadd.xlane.f32.xlu1 %v801_v15 }
 0x333   : > { %v1594_v16 = vpop.eup %1593 }
 0x334   : > { %v804_v17 = vsel %vm773_vm1, %v1594_v16, 0.0 }
 0x335   : > { %805 = vadd.xlane.f32.xlu0 %v804_v17 }
 0x337   : > { %v1596_v18 = vpop.eup %1595 }
 0x338   : > { %v807_v20 = vsel %vm773_vm1, %v1596_v18, 0.0 }
 0x339   : > { %808 = vadd.xlane.f32.xlu1 %v807_v20  ;;  %1055 = vadd.xlane.f32.xlu0 %v1051_v43 }
 0x33d   : > { %1057 = vadd.xlane.f32.xlu1 %v1052_v57 }
 0x3ba   : > { %v800_v27 = vpop.xlane.xlu0 %799 }
 0x3bb   : > { %1597 = vrcp.f32 %v800_v27 }
 0x3be   : > { %v803_v28 = vpop.xlane.xlu1 %802 }
 0x3bf   : > { %1599 = vrcp.f32 %v803_v28  ;;  %v1096_v28 = vstv %s1350_s26 }
 0x3c2   : > { %v806_v30 = vpop.xlane.xlu0 %805 }
 0x3c3   : > { %1601 = vrcp.f32 %v806_v30  ;;  %v1092_v30 = vshrl.u32 %v1091_v24, 7 }
 0x3c5   : > { %v1598_v32 = vpop.eup %1597 }
 0x3c6   : > { %v809_v31 = vpop.xlane.xlu1 %808  ;;  %v814_v34 = vmul.f32 %v1598_v32, %v1590_v11  ;;  %v1056_v9 = vpop.xlane.xlu0 %1055  ;;  %v1094_v32 = vand.u32 127, %v1091_v24 }
 0x3c7   : > { %1603 = vrcp.f32 %v809_v31 }
 0x3c8   : > { %vm1141_vm7 = vcmp.lt.s32.totalorder %v1094_v32, 7 }
 0x3c9   : > { %v1600_v33 = vpop.eup %1599 }
 0x3ca   : > { %v815_v35 = vmul.f32 %v1600_v33, %v1592_v14  ;;  %v1058_v10 = vpop.xlane.xlu1 %1057  ;;  %v1068_v33 = vstv %s1067_s9 }
 0x3cc   : > { %v818_v36 = vpack.c.bf16 %v815_v35, %v814_v34  ;;  %v1097_v34 = vadd.s32 %v1096_v28, %v1092_v30 }
 0x3cd   : > { %v1602_v37 = vpop.eup %1601 }
 0x3ce   : > { %1422 = vmatmul.mubr.msk.bf16.vlgmr.msra.gmra.mrb[12].mxu0 %vm773_vm1, %v818_v36  ;;  %v816_v39 = vmul.f32 %v1602_v37, %v1594_v16  ;;  %v1099_v42 = vadd.s32 4, %v1097_v34  ;;  %vm1098_vm2 = vcmp.ge.s32.totalorder %v1094_v32, %v1097_v34 }
 0x3cf   : > { %1426 = vmatpush3.bf16.msra.mxu0 %v686_v47  ;;  %1427 = vmatprep.mubr.msk.bf16.mxu0 %vm1852_vm0, %v1851_v29 }
 0x3d0   : > { %vm1100_vm3 = vcmp.lt.s32.totalorder %v1094_v32, %v1099_v42 }
 0x3d1   : > { %v1604_v38 = vpop.eup %1603  ;;  %vm1101_vm4 = vmand %vm1098_vm2, %vm1100_vm3 }
 0x3d2   : > { %v817_v40 = vmul.f32 %v1604_v38, %v1596_v18  ;;  %v1111_v38 = vadd.s32 4294967288, %v1094_v32 }
 0x3d4   : > { %v819_v41 = vpack.c.bf16 %v817_v40, %v816_v39 }
 0x3d6   : > { %1428 = vmatmul.mubr.msk.bf16.vlgmr.msra.gmra.mrb[16].mxu0 %vm773_vm1, %v819_v41 }
 0x4a1   : > { %v857_v29 = vpop.f32.mrb[12].mxu0 }
 0x4a2   : > { %v1423_v46 = vpop.f32.mrb[13].mxu0 }
 0x4a3   : > { %v860_v47 = vpop.f32.mrb[14].mxu0  ;;  %v1114_v46 = vsub.s32 %v1111_v38, %v1092_v30 }
 0x4a4   : > { %v908_v49 = vpack.c.bf16 %v860_v47, %v857_v29  ;;  %v1424_v50 = vpop.f32.mrb[15].mxu0  ;;  %v1086_v29 = vstv %s1085_s14 }
 0x4a6   : > { %1447 = vmatprep.mubr.bf16.mxu1 %v908_v49 }
 0x4a9   : > { %v901_v51 = vpop.f32.mrb[16].mxu0 }
 0x4aa   : > { %v1429_v52 = vpop.f32.mrb[17].mxu0 }
 0x4ab   : > { %v904_v53 = vpop.f32.mrb[18].mxu0  ;;  %v1109_v52 = vsub.s32 %v1094_v32, %v1092_v30 }
 0x4ac   : > { %v909_v54 = vpack.c.bf16 %v904_v53, %v901_v51  ;;  %v1430_v55 = vpop.f32.mrb[19].mxu0 }
 0x4ae   : > { %1448 = vmatmul.mubr.bf16.vlgmr.msra.gmra.mrb[8].mxu1 %v909_v54 }
 0x581   : > { %v1449_v58 = vpop.f32.mrb[8].mxu1 }
 0x582   : > { %v1008_v59 = vpop.f32.mrb[9].mxu1  ;;  %v1041_v60 = vmul.f32 %v1449_v58, %v1449_v58  ;;  %v1029_v7 = vmul.f32 %v1449_v58, %v1025_v1 }
 0x583   : > { %v1450_v61 = vpop.f32.mrb[10].mxu1  ;;  %v1039_v0 = vmul.f32 %v1008_v59, %v1008_v59  ;;  %v1027_v5 = vmul.f32 %v1023_v48, %v1008_v59 }
 0x584   : > { %1047 = vadd.xlane.f32.xlu0 %v1041_v60  ;;  %v1011_v62 = vpop.f32.mrb[11].mxu1  ;;  %v1042_v63 = vmul.f32 %v1450_v61, %v1450_v61  ;;  %v1030_v8 = vmul.f32 %v1450_v61, %v1026_v4  ;;  %v1853_v61 = vmov -1.0  }
 0x585   : > { %v1040_v2 = vmul.f32 %v1011_v62, %v1011_v62  ;;  %v1028_v6 = vmul.f32 %v1024_v56, %v1011_v62  ;;  %v1102_v62 = vsel %vm1101_vm4, 1.0, %v1853_v61 }
 0x586   : > { %1049 = vadd.xlane.f32.xlu1 %v1042_v63 }
 0x588   : > { %1043 = vadd.xlane.f32.xlu0 %v1039_v0 }
 0x58a   : > { %1045 = vadd.xlane.f32.xlu1 %v1040_v2 }
 0x58c   : > { %1059 = vadd.xlane.f32.xlu0 %v1053_v3 }
 0x58e   : > { %1061 = vadd.xlane.f32.xlu1 %v1054_v19 }
 0x590   : > { %1031 = vadd.xlane.f32.xlu0 %v1027_v5 }
 0x592   : > { %1033 = vadd.xlane.f32.xlu1 %v1028_v6 }
 0x594   : > { %1035 = vadd.xlane.f32.xlu0 %v1029_v7 }
 0x596   : > { %1037 = vadd.xlane.f32.xlu1 %v1030_v8 }
 0x611   : > { %v1048_v11 = vpop.xlane.xlu0 %1047 }
 0x613   : > { %v1050_v12 = vpop.xlane.xlu1 %1049 }
 0x615   : > { %v1044_v13 = vpop.xlane.xlu0 %1043 }
 0x616   : > { %v1063_v14 = vmul.f32 %v1056_v9, %v1044_v13 }
 0x617   : > { %v1046_v26 = vpop.xlane.xlu1 %1045 }
 0x618   : > { %v1073_v15 = vmax.f32 %v1063_v14, 1e-24  ;;  %v1064_v16 = vmul.f32 %v1058_v10, %v1046_v26 }
 0x619   : > { %v1060_v17 = vpop.xlane.xlu0 %1059 }
 0x61a   : > { %1605 = vrsqrt.f32 %v1073_v15  ;;  %v1074_v18 = vmax.f32 %v1064_v16, 1e-24  ;;  %v1065_v20 = vmul.f32 %v1060_v17, %v1048_v11 }
 0x61b   : > { %v1062_v21 = vpop.xlane.xlu1 %1061 }
 0x61c   : > { %1607 = vrsqrt.f32 %v1074_v18  ;;  %v1075_v22 = vmax.f32 %v1065_v20, 1e-24  ;;  %v1066_v23 = vmul.f32 %v1062_v21, %v1050_v12 }
 0x61d   : > { %v1032_v27 = vpop.xlane.xlu0 %1031 }
 0x61e   : > { %1609 = vrsqrt.f32 %v1075_v22  ;;  %v1076_v25 = vmax.f32 %v1066_v23, 1e-24  ;;  %v1069_v37 = vmul.f32 %v1068_v33, %v1032_v27 }
 0x61f   : > { %v1034_v31 = vpop.xlane.xlu1 %1033 }
 0x620   : > { %1611 = vrsqrt.f32 %v1076_v25  ;;  %v1070_v39 = vmul.f32 %v1068_v33, %v1034_v31 }
 0x621   : > { %v1036_v36 = vpop.xlane.xlu0 %1035 }
 0x622   : > { %v1071_v48 = vmul.f32 %v1068_v33, %v1036_v36 }
 0x623   : > { %v1038_v41 = vpop.xlane.xlu1 %1037 }
 0x624   : > { %v1606_v35 = vpop.eup %1605  ;;  %v1072_v50 = vmul.f32 %v1068_v33, %v1038_v41 }
 0x625   : > { %v1081_v44 = vmul.f32 %v1606_v35, %v1069_v37 }
 0x626   : > { %v1608_v40 = vpop.eup %1607 }
 0x627   : > { %v1082_v45 = vmul.f32 %v1608_v40, %v1070_v39  ;;  %v1087_v53 = vadd.f32 %v1086_v29, %v1081_v44 }
 0x628   : > { %v1610_v43 = vpop.eup %1609 }
 0x629   : > { %v1088_v47 = vadd.f32 %v1086_v29, %v1082_v45  ;;  %v1083_v49 = vmul.f32 %v1610_v43, %v1071_v48  ;;  %v1110_v58 = vrot.slane %v1087_v53, %v1109_v52 }
 0x62a   : > { %v1612_v51 = vpop.eup %1611 }
 0x62b   : > { %v1089_v54 = vadd.f32 %v1086_v29, %v1083_v49  ;;  %v1084_v55 = vmul.f32 %v1612_v51, %v1072_v50  ;;  %v1115_v56 = vrot.slane %v1088_v47, %v1114_v46 }
 0x62d   : > { %v1090_v57 = vadd.f32 %v1086_v29, %v1084_v55  ;;  %v1121_v59 = vrot.slane %v1089_v54, %v1109_v52  ;;  %v1117_v63 = vsel %vm1116_vm5, %v1115_v56, %v1110_v58 }
 0x62f   : > { %v1125_v60 = vrot.slane %v1090_v57, %v1114_v46 }
 0x631   : > { %v1126_v0 = vsel %vm1116_vm5, %v1125_v60, %v1121_v59 }
 0x632   : > { %v1128_v1 = vsel %vm1127_vm6, %v1126_v0, %v1117_v63 }
 0x633   : > { %v1130_v2 = vmul.f32 %v1128_v1, %v1102_v62 }
 0x635   : > { %v1132_v3 = vand.u32 2147483647, %v1130_v2  ;;  %v1131_v8 = vmin.f32 %v1130_v2, 0.0 }
 0x637   : > { %v1133_v4 = vsub.f32 0.0, %v1132_v3 }
 0x639   : > { %v1134_v19 = vmul.f32 1.442695, %v1133_v4 }
 0x63b   : > { %1613 = vpow2.f32 %v1134_v19 }
 0x645   : > { %v1614_v5 = vpop.eup %1613 }
 0x646   : > { %v1136_v6 = vadd.f32 1.0, %v1614_v5 }
 0x648   : > { %1615 = vlog2.f32 %v1136_v6 }
 0x652   : > { %v1616_v7 = vpop.eup %1615 }
 0x653   : > { %v1138_v9 = vmul.f32 0.6931472, %v1616_v7 }
 0x655   : > { %v1139_v10 = vsub.f32 %v1131_v8, %v1138_v9 }
 0x657   : > { %v1140_v11 = vsub.f32 0.0, %v1139_v10 }
 0x659   : > { %v1142_v12 = vsel %vm1141_vm7, %v1140_v11, 0.0 }
 0x65a   : > { %v1144_v13 = vsel %vm1143_vm8, %v1142_v12, 0.0 }
 0x65b   : > { %1145 = vadd.xlane.f32.xlu0 %v1144_v13 }
 0x6e8   : > { %v1146_v14 = vpop.xlane.xlu0 %1145 }
 0x6e9   : > { %v1147_v26 = vrot.slane %v1146_v14, 4 }
 0x6eb   : > { %v1148_v15 = vadd.f32 %v1147_v26, %v1146_v14 }
 0x6ed   : > { %v1149_v16 = vrot.slane %v1148_v15, 2 }
 0x6ef   : > { %v1150_v17 = vadd.f32 %v1149_v16, %v1148_v15 }
 0x6f1   : > { %v1151_v18 = vrot.slane %v1150_v17, 1 }
 0x6f3   : > { %v1152_v20 = vadd.f32 %v1151_v18, %v1150_v17 }
 0x6f5   : > { %1451 = vpush %v1152_v20 }
 0x726   : > { %s1452_s19 = spop %1451 }
 0x727   : > { %v1154_v21 = vstv %s1452_s19 }
 0x728   : > { %1155 = vst [vmem:[%s383_s22] sm:$0xff] %v1154_v21 }
 0x729   : > { %1774 = shalt.err (!%p1771_p3)
}
 0x72a   : > { %s1775_s3 = scalar_lea.hbm %s2219_s23, 128  ;;  %s1779_s11 = scalar_lea.hbm %s2268_s7, 256 }
 0x72b   : > { %p1776_p9 = scmp.ne.s32.totalorder %s2219_s23, %s1775_s3  ;;  %p1780_p7 = scmp.lt.u32.totalorder %s2219_s23, %s2268_s7 }
 0x72c   : > { %p1781_p12 = scmp.lt.u32.totalorder %s1779_s11, %s1775_s3  ;;  %p1783_p2 = scmp.lt.u32.totalorder %s1775_s3, %s2219_s23 }
 0x72d   : > { %p1777_p13 = pnand %p1776_p9, %p2049_p5 }
 0x72e   : > { %p1782_p1 = por %p1781_p12, %p1780_p7 }
 0x72f   : > { %p1778_p11 = pneg %p1777_p13 }
 0x730   : > { %p1784_p4 = por %p1783_p2, %p1782_p1 }
 0x732   : > { %p1785_p0 = pnand %p1784_p4, %p1778_p11 }
 0x734   : > { %1788 = shalt.err (!%p1785_p0)
}
 0x735   : > { %1469 = dma.vmem_to_hbm [thread:$0]  (%p2049_p5), %s2214_s15, 128, %s2219_s23, %s1157_s16  }
 0x736 PF: > { %s1182_s26 = sand.u32 1, %s1827_s28   ;;  %p2299_p8 = scmp.ne.s32.totalorder %s2280_s10, 0 }
 0x737   : > { %p2300_p6 = scmp.ge.s32.totalorder %s1839_s8, 2  ;;  %s1183_s14 = scalar_lea.sflag [#allocation6], %s1182_s26 }
 0x739   : > { %p1489_p10 = pnand %p2300_p6, %p2299_p8 }
 0x73b   : > { %1822 = dma.done.wait (!%p1489_p10), %s1183_s14, 128  }
 0x73c   : > { %1824 = vsyncadd (!%p1489_p10), %s1183_s14, 4294967168  ;;  %s2301_s6 = sld [smem:[#allocation19_spill]]  ;;  %p26_p3 = scmp.ge.s32.totalorder %s2014_s18, 4  }
 0x73d   : > { %s2302_s28 = smov %s1831_s29  ;;  %s2303_s29 = smov %s1835_s30 }
 0x73e   : > { %s2305_s8 = smov %s2014_s18  ;;  %28 = sbr.rel (!%p26_p3) target bundleno = 14 (0xe), region = 118 }
 0x742   : > { %s2304_s30 = smov %s2301_s6 }
 0x745   :  { %1188 = vsyncpa [#allocation5], 1 }
 0x746   :  { %1190 = vsyncpa [#allocation5 + $0x1], 1 }
 0x747   :  { %1191 = vsyncpa [#allocation8], 1 }
 0x748   :  { %1193 = vsyncpa [#allocation8 + $0x1], 1 }
 0x749   :  { %1194 = vsyncpa [#allocation11], 1 }
 0x74a   :  { %1195 = vsyncpa [#allocation6], 1 }
 0x74b   :  { %1197 = vsyncpa [#allocation6 + $0x1], 1 }

</bundles_post_ra>
